<compile_context>
chip_gen: v7x
topology: tpu7x:2x2x1
jax: 0.10.0
libtpu: 0.0.40
codegen_flags: <defaults>
</compile_context>

<pallas_src>
import functools

import jax
import jax.numpy as jnp
from jax.experimental import pallas as pl
from jax.experimental.pallas import tpu as pltpu


def _round_up(x, m):
    return ((x + m - 1) // m) * m


def _cdiv(a, b):
    return (a + b - 1) // b


def _vmem_budget_bytes():
    """Generation-aware VMEM budget (v7x: 64 MiB/TC; v5e/v6e: 128 MiB)."""
    cap = 64 * 1024 * 1024  # conservative default = v7x per-TensorCore capacity
    try:
        cap = int(pltpu.get_tpu_info().vmem_capacity_bytes)
    except Exception:
        pass
    # Leave headroom for Mosaic internal scratch / metadata.
    return min(int(cap * 0.70), 96 * 1024 * 1024)


def _pick_tm(m, max_tm):
    """Adaptive row tile: multiple of 8 sublanes, minimal M padding."""
    if m <= max_tm:
        return _round_up(m, 8)
    n = _cdiv(m, max_tm)
    return _round_up(_cdiv(m, n), 8)


def _pick_lane_tile(total, max_tile):
    """Largest divisor of `total` (a multiple of 128) that is <= max_tile."""
    units = total // 128
    best = 1
    for d in range(1, units + 1):
        if units % d == 0 and d * 128 <= max_tile:
            best = d
    return best * 128


# --------------------------------------------------------------------------
# Kernels
# --------------------------------------------------------------------------
def _fh_resident_kernel(x_ref, w_ref, b_ref, o_ref, *, compute_dtype):
    # x_ref: [tm, K] (f32 or bf16), w_ref: [K, N_pad] bf16 (VMEM-resident),
    # b_ref: [1, N_pad] f32, o_ref: [tm, N_pad].
    acc = jnp.dot(x_ref[...].astype(compute_dtype), w_ref[...],
                  preferred_element_type=jnp.float32)
    o_ref[...] = (acc + b_ref[...]).astype(o_ref.dtype)


def _fh_ktiled_kernel(x_ref, w_ref, b_ref, o_ref, acc_ref, *, compute_dtype):
    # x_ref: [tm, tk], w_ref: [tk, tn] (weight already transposed to [K, N]),
    # b_ref: [1, tn] f32, o_ref: [tm, tn], acc_ref: [tm, tn] f32 scratch.
    k = pl.program_id(2)

    @pl.when(k == 0)
    def _():
        acc_ref[...] = jnp.zeros_like(acc_ref)

    acc_ref[...] += jnp.dot(x_ref[...].astype(compute_dtype), w_ref[...],
                            preferred_element_type=jnp.float32)

    @pl.when(k == pl.num_programs(2) - 1)
    def _():
        o_ref[...] = (acc_ref[...] + b_ref[...]).astype(o_ref.dtype)


# --------------------------------------------------------------------------
# Wrapper
# --------------------------------------------------------------------------
def flatten_head(x, weight, bias, *, target_window,
                 compute_dtype=jnp.bfloat16,
                 allow_xla_fallback=True,
                 _force_ktiled=False,
                 _max_tm=256, _max_tk=2048, _max_tn=512):
    """PatchTST FlattenHead forward.

    x:      [bs, n_vars, d_model, patch_num]
    weight: [target_window, nf]   (nf = d_model * patch_num)
    bias:   [target_window]
    returns [bs, n_vars, target_window] in x.dtype.
    """
    bs, n_vars, d_model, patch_num = x.shape
    nf = d_model * patch_num
    assert weight.shape == (target_window, nf)
    assert bias.shape == (target_window,)
    out_dtype = x.dtype
    out_isz = jnp.dtype(out_dtype).itemsize
    c_isz = jnp.dtype(compute_dtype).itemsize

    M = bs * n_vars
    x2d = x.reshape(M, nf)

    # ---- tiny-problem fast path: launch/padding overhead dominates ----------
    if allow_xla_fallback and not _force_ktiled and 2 * M * nf * target_window < (1 << 22):
        y = (x2d @ weight.T + bias).astype(out_dtype)
        return y.reshape(bs, n_vars, target_window)

    N_pad = _round_up(target_window, 128)
    budget = _vmem_budget_bytes()

    # ---- adaptive row tile ---------------------------------------------------
    tm = _pick_tm(M, _max_tm)
    M_pad = _round_up(M, tm)
    n_m = M_pad // tm

    # v7x has 2 TensorCores sharding the "parallel" axes: make sure there are
    # at least two parallel grid steps when the row count allows a clean split.
    if n_m == 1 and M_pad >= 16 and (M_pad // 2) % 8 == 0:
        tm = M_pad // 2
        n_m = 2

    # ---- resident-weight feasibility (conservative: double-buffer everything)
    def _resident_footprint(tm_):
        m_pad_ = _round_up(M, tm_)
        x_isz = c_isz if m_pad_ != M else x2d.dtype.itemsize
        return (2 * nf * N_pad * c_isz          # weight (bf16)
                + 2 * tm_ * nf * x_isz          # x row slab
                + 2 * tm_ * N_pad * out_isz     # output tile
                + 2 * N_pad * 4                 # bias
                + (2 << 20))                    # Mosaic scratch slack

    use_resident = False
    if not _force_ktiled:
        cand = tm
        while cand >= 8:
            if _resident_footprint(cand) <= budget:
                use_resident = True
                tm = cand
                M_pad = _round_up(M, cand)
                n_m = M_pad // cand
                break
            nxt = _round_up(cand // 2, 8)
            if nxt >= cand:
                break
            cand = nxt

    if use_resident:
        # ------------------------------------------------------------------
        # Resident-weight path: grid = (n_m,), W fetched from HBM exactly once.
        # ------------------------------------------------------------------
        needs_pad_x = (M_pad != M)
        if needs_pad_x:
            # One fused pad+cast copy (only when row alignment forces it).
            x_in = jnp.pad(x2d, ((0, M_pad - M), (0, 0))).astype(compute_dtype)
        else:
            # No wrapper pass over x at all; cast per-tile inside the kernel.
            x_in = x2d
        # Weight transpose folded into the (small) pad/cast copy -> [K, N_pad].
        w_in = jnp.pad(weight.T, ((0, 0), (0, N_pad - target_window))).astype(compute_dtype)
        b_in = jnp.pad(bias, (0, N_pad - target_window)).astype(jnp.float32).reshape(1, N_pad)

        cost = pl.CostEstimate(
            flops=2 * M_pad * nf * N_pad,
            transcendentals=0,
            bytes_accessed=(x_in.size * x_in.dtype.itemsize
                            + w_in.size * w_in.dtype.itemsize
                            + b_in.size * 4
                            + M_pad * N_pad * out_isz),
        )

        out = pl.pallas_call(
            functools.partial(_fh_resident_kernel, compute_dtype=compute_dtype),
            out_shape=jax.ShapeDtypeStruct((M_pad, N_pad), out_dtype),
            grid_spec=pltpu.PrefetchScalarGridSpec(
                num_scalar_prefetch=0,
                grid=(n_m,),
                in_specs=[
                    pl.BlockSpec((tm, nf), lambda i: (i, 0)),       # x rows
                    pl.BlockSpec((nf, N_pad), lambda i: (0, 0)),    # resident W
                    pl.BlockSpec((1, N_pad), lambda i: (0, 0)),     # bias
                ],
                out_specs=pl.BlockSpec((tm, N_pad), lambda i: (i, 0)),
            ),
            compiler_params=pltpu.CompilerParams(
                dimension_semantics=("parallel",),
                vmem_limit_bytes=budget,
            ),
            cost_estimate=cost,
        )(x_in, w_in, b_in)
    else:
        # ------------------------------------------------------------------
        # K-tiled fallback: (M, N, K) grid, f32 accumulator, W as [K_pad, N_pad].
        # ------------------------------------------------------------------
        K_pad = _round_up(nf, 128)           # pad K only to 128, not to tk
        tk = _pick_lane_tile(K_pad, _max_tk)
        tn = _pick_lane_tile(N_pad, _max_tn)

        def _ktiled_footprint(tm_, tk_, tn_):
            x_isz = c_isz if (K_pad != nf or M_pad != M) else x2d.dtype.itemsize
            return (2 * tm_ * tk_ * x_isz + 2 * tk_ * tn_ * c_isz
                    + 2 * tm_ * tn_ * out_isz + 2 * tn_ * 4
                    + tm_ * tn_ * 4 + (2 << 20))

        while tk > 128 and _ktiled_footprint(tm, tk, tn) > budget:
            tk = _pick_lane_tile(K_pad, tk - 128)
        while tn > 128 and _ktiled_footprint(tm, tk, tn) > budget:
            tn = _pick_lane_tile(N_pad, tn - 128)

        needs_pad_x = (K_pad != nf) or (M_pad != M)
        if needs_pad_x:
            # Exact zero padding in K is required for correct accumulation.
            x_in = jnp.pad(x2d, ((0, M_pad - M), (0, K_pad - nf))).astype(compute_dtype)
        else:
            x_in = x2d
        w_in = jnp.pad(weight.T,
                       ((0, K_pad - nf), (0, N_pad - target_window))).astype(compute_dtype)
        b_in = jnp.pad(bias, (0, N_pad - target_window)).astype(jnp.float32).reshape(1, N_pad)

        n_n, n_k = N_pad // tn, K_pad // tk
        cost = pl.CostEstimate(
            flops=2 * M_pad * K_pad * N_pad,
            transcendentals=0,
            bytes_accessed=(x_in.size * x_in.dtype.itemsize * n_n
                            + w_in.size * w_in.dtype.itemsize * n_m
                            + M_pad * N_pad * out_isz),
        )

        out = pl.pallas_call(
            functools.partial(_fh_ktiled_kernel, compute_dtype=compute_dtype),
            out_shape=jax.ShapeDtypeStruct((M_pad, N_pad), out_dtype),
            grid_spec=pltpu.PrefetchScalarGridSpec(
                num_scalar_prefetch=0,
                grid=(n_m, n_n, n_k),
                in_specs=[
                    pl.BlockSpec((tm, tk), lambda i, j, k: (i, k)),   # x tile
                    pl.BlockSpec((tk, tn), lambda i, j, k: (k, j)),   # W^T tile
                    pl.BlockSpec((1, tn), lambda i, j, k: (0, j)),    # bias tile
                ],
                out_specs=pl.BlockSpec((tm, tn), lambda i, j, k: (i, j)),
                scratch_shapes=[pltpu.VMEM((tm, tn), jnp.float32)],
            ),
            compiler_params=pltpu.CompilerParams(
                dimension_semantics=("parallel", "parallel", "arbitrary"),
                vmem_limit_bytes=budget,
            ),
            cost_estimate=cost,
        )(x_in, w_in, b_in)

    # Slice padding off and restore [bs, n_vars, target_window].
    return out[:M, :target_window].reshape(bs, n_vars, target_window)


# --------------------------------------------------------------------------
# Demo / correctness check
# --------------------------------------------------------------------------
if __name__ == "__main__":
    key = jax.random.PRNGKey(0)

    def _make_inputs(key, bs, n_vars, d_model, patch_num, target_window):
        nf = d_model * patch_num
        kx, kw, kb = jax.random.split(key, 3)
        x = jax.random.normal(kx, (bs, n_vars, d_model, patch_num), dtype=jnp.float32)
        bound = 1.0 / (nf ** 0.5)
        w = jax.random.uniform(kw, (target_window, nf), minval=-bound, maxval=bound,
                               dtype=jnp.float32)
        b = jax.random.uniform(kb, (target_window,), minval=-bound, maxval=bound,
                               dtype=jnp.float32)
        return x, w, b

    def _check(y, x, w, b, target_window):
        bs, n_vars = x.shape[0], x.shape[1]
        nf = x.shape[2] * x.shape[3]
        ref = x.reshape(bs, n_vars, nf) @ w.T + b
        assert y.shape == (bs, n_vars, target_window)
        # bf16 MXU operands (f32 accumulate) -> relaxed tolerance vs f32 reference.
        err = float(jnp.max(jnp.abs(y - ref)))
        assert jnp.allclose(y, ref, atol=3e-2, rtol=3e-2), err

    # Test 1: resident-weight Pallas path (M aligned -> x passed with no copy).
    k1, k2 = jax.random.split(key)
    x1, w1, b1 = _make_inputs(k1, bs=2, n_vars=4, d_model=16, patch_num=8,
                              target_window=32)
    y1 = flatten_head(x1, w1, b1, target_window=32, allow_xla_fallback=False)
    y1 = jax.block_until_ready(y1)
    _check(y1, x1, w1, b1, 32)

    # Test 2: K-tiled fallback path (forced, 2 K-steps exercise the accumulator).
    x2, w2, b2 = _make_inputs(k2, bs=2, n_vars=4, d_model=16, patch_num=16,
                              target_window=32)
    y2 = flatten_head(x2, w2, b2, target_window=32, allow_xla_fallback=False,
                      _force_ktiled=True, _max_tk=128)
    y2 = jax.block_until_ready(y2)
    _check(y2, x2, w2, b2, 32)

    print("KERNEL_OK")
</pallas_src>

<mosaic_0001>
module attributes {stable_mosaic.version = 11 : i64} {
  func.func @_fh_resident_kernel(%arg0: i32, %arg1: memref<8x128xf32, #tpu.memory_space<vmem>>, %arg2: memref<128x128xbf16, #tpu.memory_space<vmem>>, %arg3: memref<1x128xf32, #tpu.memory_space<vmem>>, %arg4: memref<8x128xf32, #tpu.memory_space<vmem>>) attributes {dimension_semantics = [#tpu.dimension_semantics<parallel>], iteration_bounds = array<i64: 1>, scalar_prefetch = 0 : i64, scratch_operands = 0 : i64, tpu.core_type = #tpu.core_type<tc>, window_params = [{transform_indices = @transform_0, window_bounds = array<i64: 8, 128>}, {pipeline_mode = #tpu.pipeline_mode<synchronous>, transform_indices = @transform_1, window_bounds = array<i64: 128, 128>}, {pipeline_mode = #tpu.pipeline_mode<synchronous>, transform_indices = @transform_2, window_bounds = array<i64: 1, 128>}, {transform_indices = @transform_3, window_bounds = array<i64: 8, 128>}]} {
    %c0 = arith.constant 0 : index
    %c0_0 = arith.constant 0 : index
    %0 = vector.load %arg1[%c0, %c0_0] : memref<8x128xf32, #tpu.memory_space<vmem>>, vector<8x128xf32>
    %1 = arith.truncf %0 : vector<8x128xf32> to vector<8x128xbf16>
    %c0_1 = arith.constant 0 : index
    %c0_2 = arith.constant 0 : index
    %2 = vector.load %arg2[%c0_1, %c0_2] : memref<128x128xbf16, #tpu.memory_space<vmem>>, vector<128x128xbf16>
    %cst = arith.constant dense<0.000000e+00> : vector<8x128xf32>
    %3 = tpu.matmul %1, %2, %cst {dimension_numbers = #tpu.dot_dimension_numbers<[1], [0], [0], [1], [0, 0, 1, 1], [], []>} : vector<8x128xbf16>, vector<128x128xbf16>, vector<8x128xf32> -> vector<8x128xf32>
    %c0_3 = arith.constant 0 : index
    %c0_4 = arith.constant 0 : index
    %4 = vector.load %arg3[%c0_3, %c0_4] : memref<1x128xf32, #tpu.memory_space<vmem>>, vector<1x128xf32>
    %5 = vector.broadcast %4 : vector<1x128xf32> to vector<8x128xf32>
    %6 = arith.addf %3, %5 : vector<8x128xf32>
    %c0_5 = arith.constant 0 : index
    %c0_6 = arith.constant 0 : index
    %7 = vector.load %arg4[%c0_5, %c0_6] : memref<8x128xf32, #tpu.memory_space<vmem>>, vector<8x128xf32>
    tpu.vector_store %arg4[%c0_5, %c0_6], %6 {strides = array<i32>} : memref<8x128xf32, #tpu.memory_space<vmem>>, vector<8x128xf32>,
    return
  }
  func.func @transform_0(%arg0: i32) -> (i32, i32) {
    %c0_i32 = arith.constant 0 : i32
    %c0_i32_0 = arith.constant 0 : i32
    return %arg0, %c0_i32 : i32, i32
  }
  func.func @transform_1(%arg0: i32) -> (i32, i32) {
    %c0_i32 = arith.constant 0 : i32
    %c0_i32_0 = arith.constant 0 : i32
    %c0_i32_1 = arith.constant 0 : i32
    return %c0_i32, %c0_i32_0 : i32, i32
  }
  func.func @transform_2(%arg0: i32) -> (i32, i32) {
    %c0_i32 = arith.constant 0 : i32
    %c0_i32_0 = arith.constant 0 : i32
    %c0_i32_1 = arith.constant 0 : i32
    return %c0_i32, %c0_i32_0 : i32, i32
  }
  func.func @transform_3(%arg0: i32) -> (i32, i32) {
    %c0_i32 = arith.constant 0 : i32
    %c0_i32_0 = arith.constant 0 : i32
    return %arg0, %c0_i32 : i32, i32
  }
}

</mosaic_0001>

<bundles_post_ra>
// kernel: tpu_custom_call.1
= control target key start
LH: loop header
LB: loop body
LE: loop exit
PB: predicated region body
PF: predicated region fallthrough
CT: control target
= control target key end

     0   :  { %8 = vsyncpa [#allocation3], 0  ;;  %s370_s0 = inlined_call_operand.hbm [shape: f32[8,128], index: 0, kind: input, shape index: {}]   ;;  %s371_s1 = inlined_call_operand.hbm [shape: bf16[128,128], index: 1, kind: input, shape index: {}]   ;;  %s372_s2 = inlined_call_operand.vmem [shape: f32[1,128], index: 2, kind: input, shape index: {}]   ;;  %s373_s3 = inlined_call_operand.hbm [shape: f32[8,128], index: 3, kind: output, shape index: {}]  }
   0x1   :  { %9 = vsyncpa [#allocation6], 0 }
   0x2   :  { %10 = vsyncpa [#allocation4], 0  ;;  %s297_s12 = smov [#allocation2]   ;;  %s298_s14 = smov [#allocation5]  }
   0x3   :  { %s17_s13 = sshll.u32 %s297_s12, 4  ;;  %s26_s15 = sshll.u32 %s298_s14, 4  ;;  %s18_s13 = int_to_ptr.vmem [resolvable:$true] %s17_s13  ;;  %s324_s15 = int_to_ptr.vmem [resolvable:$true] %s26_s15 }
   0x4   :  { %s225_s18 = scalar_lea.hbm %s370_s0, 128 }
   0x5   :  { %p226_p0 = scmp.ne.s32.totalorder %s370_s0, %s225_s18  ;;  %p229_p1 = scmp.lt.u32.totalorder %s225_s18, %s370_s0 }
   0x7   :  { %p231_p2 = pnand %p229_p1, %p226_p0 }
   0x9   :  { %234 = shalt.err (!%p231_p2)
}
   0xa   :  { %s235_s23 = scalar_lea.vmem %s18_s13, 128  ;;  %p240_p4 = scmp.lt.s32.totalorder %s18_s13, %s18_s13 }
   0xb   :  { %p236_p3 = scmp.ne.s32.totalorder %s18_s13, %s235_s23  ;;  %p241_p5 = scmp.lt.s32.totalorder %s235_s23, %s235_s23 }
   0xd   :  { %p242_p6 = por %p241_p5, %p240_p4 }
   0xf   :  { %p243_p7 = pnand %p242_p6, %p236_p3 }
  0x11   :  { %246 = shalt.err (!%p243_p7)
}
  0x12   :  { %20 = dma.hbm_to_vmem [thread:$0]  %s370_s0, 128, %s18_s13, [#allocation3]  }
  0x13   :  { %s247_s28 = scalar_lea.hbm %s371_s1, 1024 }
  0x14   :  { %p248_p8 = scmp.ne.s32.totalorder %s371_s1, %s247_s28  ;;  %p251_p9 = scmp.lt.u32.totalorder %s247_s28, %s371_s1 }
  0x16   :  { %p253_p10 = pnand %p251_p9, %p248_p8 }
  0x18   :  { %256 = shalt.err (!%p253_p10)
}
  0x19   :  { %s257_s6 = scalar_lea.vmem %s324_s15, 1024  ;;  %p262_p12 = scmp.lt.s32.totalorder %s324_s15, %s324_s15 }
  0x1a   :  { %p258_p11 = scmp.ne.s32.totalorder %s324_s15, %s257_s6  ;;  %p263_p13 = scmp.lt.s32.totalorder %s257_s6, %s257_s6 }
  0x1c   :  { %p264_p0 = por %p263_p13, %p262_p12 }
  0x1e   :  { %p265_p1 = pnand %p264_p0, %p258_p11 }
  0x20   :  { %268 = shalt.err (!%p265_p1)
}
  0x21   :  { %s299_s0 = smov 64   ;;  %s300_s7 = smov 4  }
  0x22   :  { %32 = dma.hbm_to_vmem [thread:$0]  %s371_s1, 1024, %s324_s15, [#allocation6], %s299_s0, %s299_s0, %s300_s7  }
  0x23   :  { %291 = dma.done.wait [#allocation3], 128  }
  0x24   :  { %292 = vsyncadd [#allocation3], 4294967168 }
  0x25   :  { %293 = dma.done.wait [#allocation6], 1024  }
  0x26   :  { %294 = vsyncadd [#allocation6], 4294966272  ;;  %v301_v0 = vmov 0.0   ;;  %vm302_vm0 = vmmov 0   ;;  %v217_v1 = vld [vmem:[#allocation5] sm:$0xff]   ;;  %v218_v2 = vld [vmem:[#allocation5 + $0x8] sm:$0xff]  }
  0x27   :  { %190 = vmatprep.subr.bf16.mxu0 %v301_v0  ;;  %206 = vmatprep.mubr.msk.bf16.mxu0 %vm302_vm0, %v301_v0  ;;  %v219_v3 = vld [vmem:[#allocation5 + $0x10] sm:$0xff]   ;;  %v220_v4 = vld [vmem:[#allocation5 + $0x18] sm:$0xff]   ;;  %v221_v5 = vld [vmem:[#allocation5 + $0x20] sm:$0xff]   ;;  %s303_s11 = smov [#allocation7]  }
  0x28   :  { %191 = vmatpush3.bf16.msra.mxu0 %v217_v1  ;;  %v222_v6 = vld [vmem:[#allocation5 + $0x28] sm:$0xff]   ;;  %v223_v7 = vld [vmem:[#allocation5 + $0x30] sm:$0xff]   ;;  %v224_v8 = vld [vmem:[#allocation5 + $0x38] sm:$0xff]   ;;  %s162_s12 = sshll.u32 %s303_s11, 4  ;;  %s163_s12 = int_to_ptr.vmem [resolvable:$true] %s162_s12 }
  0x29   :  { %192 = vmatprep.subr.bf16.mxu0 %v301_v0  ;;  %v42_v9 = vld [vmem:[#allocation2] sm:$0xff]  ;;  %s269_s13 = scalar_lea.vmem %s163_s12, 128  ;;  %p274_p3 = scmp.lt.s32.totalorder %s163_s12, %s163_s12 }
  0x2a   :  { %v43_v10 = vpack.c.bf16 %v42_v9, %v42_v9  ;;  %v172_v11 = vld [vmem:[%s372_s2] ss:$0 sm:$0xff]  ;;  %p270_p2 = scmp.ne.s32.totalorder %s163_s12, %s269_s13  ;;  %p275_p4 = scmp.lt.s32.totalorder %s269_s13, %s269_s13 }
  0x2c   :  { %193 = vmatpush3.bf16.msra.mxu0 %v218_v2  ;;  %p276_p5 = por %p275_p4, %p274_p3 }
  0x2d   :  { %194 = vmatprep.subr.bf16.mxu0 %v301_v0 }
  0x2e   :  { %p277_p6 = pnand %p276_p5, %p270_p2 }
  0x30   :  { %195 = vmatpush3.bf16.msra.mxu0 %v219_v3 }
  0x31   :  { %196 = vmatprep.subr.bf16.mxu0 %v301_v0 }
  0x34   :  { %197 = vmatpush3.bf16.msra.mxu0 %v220_v4 }
  0x35   :  { %198 = vmatprep.subr.bf16.mxu0 %v301_v0 }
  0x38   :  { %199 = vmatpush3.bf16.msra.mxu0 %v221_v5 }
  0x39   :  { %200 = vmatprep.subr.bf16.mxu0 %v301_v0 }
  0x3c   :  { %201 = vmatpush3.bf16.msra.mxu0 %v222_v6 }
  0x3d   :  { %202 = vmatprep.subr.bf16.mxu0 %v301_v0 }
  0x40   :  { %203 = vmatpush3.bf16.msra.mxu0 %v223_v7 }
  0x41   :  { %204 = vmatprep.subr.bf16.mxu0 %v301_v0 }
  0x44   :  { %205 = vmatpush3.bf16.msra.mxu0 %v224_v8 }
  0x47   :  { %207 = vmatmul.mubr.bf16.vlgmr.msra.gmra.mrb[0].mxu0 %v43_v10 }
 0x11a   :  { %v149_v12 = vpop.f32.mrb[0].mxu0 }
 0x11b   :  { %v150_v13 = vadd.f32 %v172_v11, %v149_v12  ;;  %v208_v14 = vpop.f32.mrb[1].mxu0 }
 0x11c   :  { %v152_v15 = vpop.f32.mrb[2].mxu0 }
 0x11d   :  { %155 = vst [vmem:[#allocation7] sm:$0xff] %v150_v13  ;;  %v209_v16 = vpop.f32.mrb[3].mxu0 }
 0x11e   :  { %280 = shalt.err (!%p277_p6)
}
 0x11f   :  { %s281_s2 = scalar_lea.hbm %s373_s3, 128 }
 0x120   :  { %p282_p7 = scmp.ne.s32.totalorder %s373_s3, %s281_s2  ;;  %p285_p8 = scmp.lt.u32.totalorder %s281_s2, %s373_s3 }
 0x122   :  { %p287_p9 = pnand %p285_p8, %p282_p7 }
 0x124   :  { %290 = shalt.err (!%p287_p9)
}
 0x125   :  { %165 = dma.vmem_to_hbm [thread:$0]  %s163_s12, 128, %s373_s3, [#allocation4]  }
 0x126   :  { %295 = dma.done.wait [#allocation4], 128  }
 0x127   :  { %296 = vsyncadd [#allocation4], 4294967168 }
 0x128   :  { %169 = vsyncpa [#allocation3], 1 }
 0x129   :  { %170 = vsyncpa [#allocation6], 1 }
 0x12a   :  { %171 = vsyncpa [#allocation4], 1 }

</bundles_post_ra>
